<compile_context>
chip_gen: v7x
topology: tpu7x:2x2x1
jax: 0.10.0
libtpu: 0.0.40
codegen_flags: <defaults>
</compile_context>

<pallas_src>
import math

import jax
import jax.numpy as jnp
from jax import lax
from jax.experimental import pallas as pl
from jax.experimental.pallas import tpu as pltpu


def _mlp_kernel(x_ref, w1_ref, w3_ref, w2_ref, o_ref, acc_ref):
    j = pl.program_id(1)

    @pl.when(j == 0)
    def _init():
        acc_ref[...] = jnp.zeros_like(acc_ref)

    x = x_ref[...]                                  # (tile_m, dim_p), native dtype
    w1 = w1_ref[...]                                # (tile_h, dim_p)
    w3 = w3_ref[...]                                # (tile_h, dim_p)

    # h1 = x @ w1_blk^T, h3 = x @ w3_blk^T : contract the shared `dim` axis of
    # both operands (MXU trans_b path) -> no weight transpose in HBM.
    dn = (((1,), (1,)), ((), ()))
    h1 = lax.dot_general(x, w1, dn, preferred_element_type=jnp.float32)
    h3 = lax.dot_general(x, w3, dn, preferred_element_type=jnp.float32)

    gate = h1 * jax.nn.sigmoid(h1)                  # SiLU in f32 (EUP sigmoid)
    h = (gate * h3).astype(w2_ref.dtype)            # back to MXU input dtype

    # acc += h @ w2_blk^T ; w2_blk is (dim_p, tile_h): contract the hidden axis.
    acc_ref[...] += lax.dot_general(h, w2_ref[...], dn,
                                    preferred_element_type=jnp.float32)

    @pl.when(j == pl.num_programs(1) - 1)
    def _flush():
        o_ref[...] = acc_ref[...].astype(o_ref.dtype)


def _round_up(v, m):
    return (v + m - 1) // m * m


def _pad2d(a, rows, cols):
    pr, pc = rows - a.shape[0], cols - a.shape[1]
    if pr == 0 and pc == 0:
        return a
    return jnp.pad(a, ((0, pr), (0, pc)))


def mlp_forward(x, w1, w2, w3, *, tile_m=256, tile_h=256):
    """SwiGLU MLP forward.

    x : (..., dim)      activations
    w1: (hidden, dim)   nn.Linear(dim, hidden).weight  (gate proj)
    w2: (dim, hidden)   nn.Linear(hidden, dim).weight  (down proj)
    w3: (hidden, dim)   nn.Linear(dim, hidden).weight  (up proj)
    """
    orig_shape = x.shape
    dim = x.shape[-1]
    hidden = w1.shape[0]
    assert w3.shape == (hidden, dim) and w2.shape == (dim, hidden)

    M = math.prod(orig_shape[:-1])
    x2d = x.reshape(M, dim)

    lane = 128
    # sublane packing: 8 rows for 4-byte dtypes, 16 for 2-byte (bf16)
    row_align = 8 if jnp.dtype(x.dtype).itemsize >= 4 else 16

    dim_p = _round_up(dim, lane)
    tile_h = _round_up(min(tile_h, _round_up(hidden, lane)), lane)
    hidden_p = _round_up(hidden, tile_h)
    tile_m = min(_round_up(tile_m, row_align), _round_up(M, row_align))
    m_p = _round_up(M, tile_m)

    # NOTE: in production store the weights pre-padded once; these pads are
    # no-ops when shapes are already 128-aligned.
    x_p = _pad2d(x2d, m_p, dim_p)
    w1_p = _pad2d(w1, hidden_p, dim_p)
    w3_p = _pad2d(w3, hidden_p, dim_p)
    w2_p = _pad2d(w2, dim_p, hidden_p)

    grid = (m_p // tile_m, hidden_p // tile_h)

    flops = 2 * m_p * dim_p * hidden_p * 3
    bytes_accessed = (
        x_p.size * x_p.dtype.itemsize
        + (grid[0]) * (w1_p.size + w3_p.size + w2_p.size) * w1_p.dtype.itemsize
        + m_p * dim_p * x_p.dtype.itemsize
    )

    out_p = pl.pallas_call(
        _mlp_kernel,
        out_shape=jax.ShapeDtypeStruct((m_p, dim_p), x.dtype),
        grid_spec=pltpu.PrefetchScalarGridSpec(
            num_scalar_prefetch=0,
            grid=grid,
            in_specs=[
                pl.BlockSpec((tile_m, dim_p), lambda i, j: (i, 0)),   # x rows
                pl.BlockSpec((tile_h, dim_p), lambda i, j: (j, 0)),   # w1 slab
                pl.BlockSpec((tile_h, dim_p), lambda i, j: (j, 0)),   # w3 slab
                pl.BlockSpec((dim_p, tile_h), lambda i, j: (0, j)),   # w2 slab
            ],
            out_specs=pl.BlockSpec((tile_m, dim_p), lambda i, j: (i, 0)),
            scratch_shapes=[pltpu.VMEM((tile_m, dim_p), jnp.float32)],
        ),
        compiler_params=pltpu.CompilerParams(
            dimension_semantics=("parallel", "arbitrary"),
            vmem_limit_bytes=64 * 1024 * 1024,
        ),
        cost_estimate=pl.CostEstimate(
            flops=flops,
            transcendentals=m_p * hidden_p,
            bytes_accessed=bytes_accessed,
        ),
    )(x_p, w1_p, w3_p, w2_p)

    return out_p[:M, :dim].reshape(orig_shape)


def _reference(x, w1, w2, w3):
    xf = x.astype(jnp.float32)
    h1 = jnp.einsum("...d,hd->...h", xf, w1.astype(jnp.float32))
    h3 = jnp.einsum("...d,hd->...h", xf, w3.astype(jnp.float32))
    h = (h1 * jax.nn.sigmoid(h1)) * h3
    return jnp.einsum("...h,dh->...d", h, w2.astype(jnp.float32))


if __name__ == "__main__":
    # Module config mirroring MLP(dim, hidden_dim=None, multiple_of, dropout):
    dim = 64
    multiple_of = 32
    hidden_dim = 4 * dim
    hidden_dim = int(2 * hidden_dim / 3)
    hidden_dim = multiple_of * ((hidden_dim + multiple_of - 1) // multiple_of)  # 192
    dropout = 0.0  # inference: dropout is identity

    batch, seq = 2, 8

    key = jax.random.PRNGKey(0)
    kx, k1, k2, k3 = jax.random.split(key, 4)

    x = jax.random.normal(kx, (batch, seq, dim), dtype=jnp.float32)
    # nn.Linear(in, out, bias=False) stores weight as (out, in)
    w1 = jax.random.normal(k1, (hidden_dim, dim), dtype=jnp.float32) * 0.05
    w2 = jax.random.normal(k2, (dim, hidden_dim), dtype=jnp.float32) * 0.05
    w3 = jax.random.normal(k3, (hidden_dim, dim), dtype=jnp.float32) * 0.05

    ref = _reference(x, w1, w2, w3)

    # f32 path; tile_h=128 so the hidden grid axis actually accumulates (2 steps).
    out = jax.block_until_ready(mlp_forward(x, w1, w2, w3, tile_h=128))
    assert out.shape == (batch, seq, dim)
    assert jnp.allclose(out, ref, atol=1e-4, rtol=1e-4)

    # bf16 fast path (bf16 MXU operands, f32 accumulation): looser tolerance.
    xb, w1b, w2b, w3b = (a.astype(jnp.bfloat16) for a in (x, w1, w2, w3))
    out_bf16 = jax.block_until_ready(mlp_forward(xb, w1b, w2b, w3b))
    assert out_bf16.shape == (batch, seq, dim)
    assert jnp.allclose(out_bf16.astype(jnp.float32), ref, atol=5e-2, rtol=5e-2)

    print("KERNEL_OK")
</pallas_src>

<mosaic_0001>
module attributes {stable_mosaic.version = 11 : i64} {
  func.func @_mlp_kernel(%arg0: i32, %arg1: i32, %arg2: memref<16x128xf32, #tpu.memory_space<vmem>>, %arg3: memref<128x128xf32, #tpu.memory_space<vmem>>, %arg4: memref<128x128xf32, #tpu.memory_space<vmem>>, %arg5: memref<128x128xf32, #tpu.memory_space<vmem>>, %arg6: memref<16x128xf32, #tpu.memory_space<vmem>>, %arg7: memref<16x128xf32, #tpu.memory_space<vmem>>) attributes {dimension_semantics = [#tpu.dimension_semantics<parallel>, #tpu.dimension_semantics<arbitrary>], iteration_bounds = array<i64: 1, 2>, scalar_prefetch = 0 : i64, scratch_operands = 1 : i64, tpu.core_type = #tpu.core_type<tc>, window_params = [{transform_indices = @transform_0, window_bounds = array<i64: 16, 128>}, {transform_indices = @transform_1, window_bounds = array<i64: 128, 128>}, {transform_indices = @transform_2, window_bounds = array<i64: 128, 128>}, {transform_indices = @transform_3, window_bounds = array<i64: 128, 128>}, {transform_indices = @transform_4, window_bounds = array<i64: 16, 128>}]} {
    %c0_i32 = arith.constant 0 : i32
    %0 = arith.cmpi eq, %arg1, %c0_i32 : i32
    %1 = arith.extui %0 : i1 to i32
    %c0_i32_0 = arith.constant 0 : i32
    %2 = arith.cmpi ne, %1, %c0_i32_0 : i32
    scf.if %2 {
      %cst_16 = arith.constant 0.000000e+00 : f32
      %23 = vector.broadcast %cst_16 : f32 to vector<16x128xf32>
      %c0_17 = arith.constant 0 : index
      %c0_18 = arith.constant 0 : index
      %24 = vector.load %arg7[%c0_17, %c0_18] : memref<16x128xf32, #tpu.memory_space<vmem>>, vector<16x128xf32>
      tpu.vector_store %arg7[%c0_17, %c0_18], %23 {strides = array<i32>} : memref<16x128xf32, #tpu.memory_space<vmem>>, vector<16x128xf32>,
    } else {
    }
    %c0 = arith.constant 0 : index
    %c0_1 = arith.constant 0 : index
    %3 = vector.load %arg2[%c0, %c0_1] : memref<16x128xf32, #tpu.memory_space<vmem>>, vector<16x128xf32>
    %c0_2 = arith.constant 0 : index
    %c0_3 = arith.constant 0 : index
    %4 = vector.load %arg3[%c0_2, %c0_3] : memref<128x128xf32, #tpu.memory_space<vmem>>, vector<128x128xf32>
    %c0_4 = arith.constant 0 : index
    %c0_5 = arith.constant 0 : index
    %5 = vector.load %arg4[%c0_4, %c0_5] : memref<128x128xf32, #tpu.memory_space<vmem>>, vector<128x128xf32>
    %cst = arith.constant dense<0.000000e+00> : vector<16x128xf32>
    %6 = tpu.matmul %3, %4, %cst {dimension_numbers = #tpu.dot_dimension_numbers<[1], [1], [0], [0], [0, 0, 1, 0], [], []>} : vector<16x128xf32>, vector<128x128xf32>, vector<16x128xf32> -> vector<16x128xf32>
    %cst_6 = arith.constant dense<0.000000e+00> : vector<16x128xf32>
    %7 = tpu.matmul %3, %5, %cst_6 {dimension_numbers = #tpu.dot_dimension_numbers<[1], [1], [0], [0], [0, 0, 1, 0], [], []>} : vector<16x128xf32>, vector<128x128xf32>, vector<16x128xf32> -> vector<16x128xf32>
    %8 = arith.negf %6 : vector<16x128xf32>
    %9 = math.exp %8 : vector<16x128xf32>
    %cst_7 = arith.constant 1.000000e+00 : f32
    %10 = vector.broadcast %cst_7 : f32 to vector<16x128xf32>
    %11 = arith.addf %10, %9 : vector<16x128xf32>
    %12 = arith.divf %10, %11 : vector<16x128xf32>
    %13 = arith.mulf %6, %12 : vector<16x128xf32>
    %14 = arith.mulf %13, %7 : vector<16x128xf32>
    %c0_8 = arith.constant 0 : index
    %c0_9 = arith.constant 0 : index
    %15 = vector.load %arg7[%c0_8, %c0_9] : memref<16x128xf32, #tpu.memory_space<vmem>>, vector<16x128xf32>
    %c0_10 = arith.constant 0 : index
    %c0_11 = arith.constant 0 : index
    %16 = vector.load %arg5[%c0_10, %c0_11] : memref<128x128xf32, #tpu.memory_space<vmem>>, vector<128x128xf32>
    %cst_12 = arith.constant dense<0.000000e+00> : vector<16x128xf32>
    %17 = tpu.matmul %14, %16, %cst_12 {dimension_numbers = #tpu.dot_dimension_numbers<[1], [1], [0], [0], [0, 0, 1, 0], [], []>} : vector<16x128xf32>, vector<128x128xf32>, vector<16x128xf32> -> vector<16x128xf32>
    %18 = arith.addf %15, %17 : vector<16x128xf32>
    %c0_13 = arith.constant 0 : index
    %c0_14 = arith.constant 0 : index
    %19 = vector.load %arg7[%c0_13, %c0_14] : memref<16x128xf32, #tpu.memory_space<vmem>>, vector<16x128xf32>
    tpu.vector_store %arg7[%c0_13, %c0_14], %18 {strides = array<i32>} : memref<16x128xf32, #tpu.memory_space<vmem>>, vector<16x128xf32>,
    %c1_i32 = arith.constant 1 : i32
    %20 = arith.cmpi eq, %arg1, %c1_i32 : i32
    %21 = arith.extui %20 : i1 to i32
    %c0_i32_15 = arith.constant 0 : i32
    %22 = arith.cmpi ne, %21, %c0_i32_15 : i32
    scf.if %22 {
      %c0_16 = arith.constant 0 : index
      %c0_17 = arith.constant 0 : index
      %23 = vector.load %arg7[%c0_16, %c0_17] : memref<16x128xf32, #tpu.memory_space<vmem>>, vector<16x128xf32>
      %c0_18 = arith.constant 0 : index
      %c0_19 = arith.constant 0 : index
      %24 = vector.load %arg6[%c0_18, %c0_19] : memref<16x128xf32, #tpu.memory_space<vmem>>, vector<16x128xf32>
      tpu.vector_store %arg6[%c0_18, %c0_19], %23 {strides = array<i32>} : memref<16x128xf32, #tpu.memory_space<vmem>>, vector<16x128xf32>,
    } else {
    }
    return
  }
  func.func @transform_0(%arg0: i32, %arg1: i32) -> (i32, i32) {
    %c0_i32 = arith.constant 0 : i32
    %c0_i32_0 = arith.constant 0 : i32
    return %arg0, %c0_i32 : i32, i32
  }
  func.func @transform_1(%arg0: i32, %arg1: i32) -> (i32, i32) {
    %c0_i32 = arith.constant 0 : i32
    %c0_i32_0 = arith.constant 0 : i32
    return %arg1, %c0_i32 : i32, i32
  }
  func.func @transform_2(%arg0: i32, %arg1: i32) -> (i32, i32) {
    %c0_i32 = arith.constant 0 : i32
    %c0_i32_0 = arith.constant 0 : i32
    return %arg1, %c0_i32 : i32, i32
  }
  func.func @transform_3(%arg0: i32, %arg1: i32) -> (i32, i32) {
    %c0_i32 = arith.constant 0 : i32
    %c0_i32_0 = arith.constant 0 : i32
    return %c0_i32, %arg1 : i32, i32
  }
  func.func @transform_4(%arg0: i32, %arg1: i32) -> (i32, i32) {
    %c0_i32 = arith.constant 0 : i32
    %c0_i32_0 = arith.constant 0 : i32
    return %arg0, %c0_i32 : i32, i32
  }
}

</mosaic_0001>

<bundles_post_ra>
// kernel: tpu_custom_call.1
= control target key start
LH: loop header
LB: loop body
LE: loop exit
PB: predicated region body
PF: predicated region fallthrough
CT: control target
= control target key end

     0   :  { %s1724_s0 = inlined_call_operand.hbm [shape: f32[16,128], index: 0, kind: input, shape index: {}]   ;;  %s1725_s1 = inlined_call_operand.hbm [shape: f32[256,128], index: 1, kind: input, shape index: {}]   ;;  %s1726_s2 = inlined_call_operand.hbm [shape: f32[256,128], index: 2, kind: input, shape index: {}]   ;;  %s1727_s3 = inlined_call_operand.hbm [shape: f32[128,256], index: 3, kind: input, shape index: {}]   ;;  %s1728_s4 = inlined_call_operand.hbm [shape: f32[16,128], index: 4, kind: output, shape index: {}]  }
   0x1   :  { %1739 = sst [smem:[#allocation16_spill]] %s1725_s1 }
   0x2   :  { %1740 = sst [smem:[#allocation17_spill]] %s1726_s2 }
   0x3   :  { %9 = vsyncpa [#allocation4], 0 }
   0x4   :  { %10 = vsyncpa [#allocation7], 0 }
   0x5   :  { %12 = vsyncpa [#allocation7 + $0x1], 0 }
   0x6   :  { %13 = vsyncpa [#allocation10], 0 }
   0x7   :  { %15 = vsyncpa [#allocation10 + $0x1], 0 }
   0x8   :  { %16 = vsyncpa [#allocation5], 0  ;;  %s1388_s15 = smov 0   ;;  %s1390_s16 = smov 0  }
   0x9   :  { %s1392_s17 = smov 0   ;;  %s1394_s18 = smov 0  }
   0xa   :  { %s1396_s19 = smov 0   ;;  %s1398_s20 = smov 0  }
   0xb LB: > { %s31_s21 = sadd.s32 1, %s1346_s19  ;;  %s67_s22 = sadd.s32 1, %s1338_s17  ;;  %s1350_s20 = sphi %s1398_s20, %s22_s20   ;;  %s1346_s19 = sphi %s1396_s19, %s1762_s19   ;;  %s1342_s18 = sphi %s1394_s18, %s1761_s18   ;;  %s1338_s17 = sphi %s1392_s17, %s1760_s17   ;;  %s1334_s16 = sphi %s1390_s16, %s1759_s16   ;;  %s1330_s15 = sphi %s1388_s15, %s1758_s15  }
   0xc   : > { %p32_p0 = scmp.ge.s32.totalorder %s31_s21, 2  ;;  %p74_p1 = scmp.ne.s32.totalorder %s1338_s17, %s1334_s16 }
   0xd   : > { %p75_p2 = scmp.eq.s32.totalorder %s1350_s20, 0  ;;  %p1076_p5 = scmp.lt.s32.totalorder %s1350_s20, 2 }
   0xe   : > { %s1764_s21 = smov (%p32_p0, %s31_s21), 0  ;;  %s198_s25 = sand.u32 1, %s1350_s20  }
   0xf   : > { %p1425_p3 = por %p75_p2, %p74_p1  ;;  %s64_s24 = ssub.s32 %s1346_s19, %s1764_s21 }
  0x10   : > { %p65_p4 = scmp.eq.s32.totalorder %s64_s24, 0  ;;  %s1729_s26 = sand.u32 1, %s1338_s17  }
  0x11   : > { %s1439_s28 = sshll.u32 %s1729_s26, 7  ;;  %s790_s29 = sshll.u32 %s1346_s19, 11 }
  0x12   : > { %s1435_s27 = scalar_select %p65_p4, %s1338_s17, %s67_s22  }
  0x13   : > { %s1742_s1 = sld [smem:[#allocation16_spill]]  ;;  %s202_s7 = scalar_lea.vmem [#allocation6], %s1439_s28 }
  0x14   : > { %s209_s8 = sshll.u32 %s202_s7, 4  ;;  %p1452_p6 = pnand %p1076_p5, %p1425_p3  ;;  %s1448_s8 = int_to_ptr.vmem [resolvable:$true] %s209_s8 }
  0x15   : > { %s1744_s2 = sld [smem:[#allocation17_spill]]  ;;  %s1461_s13 = scalar_lea.sflag [#allocation7], %s198_s25 }
  0x16   : > { %s1743_s9 = scalar_select %p1452_p6, 1, 0 }
  0x17   : > { %p1467_p8 = pneg %p1452_p6 }
  0x19   : > { %s1445_s6 = scalar_lea.hbm %s1742_s1, %s790_s29  ;;  %s1149_s30 = scalar_lea.hbm %s1742_s1, 4096 }
  0x1a   : > { %s1144_s14 = scalar_lea.hbm %s1445_s6, 2048  ;;  %p1150_p11 = scmp.lt.u32.totalorder %s1445_s6, %s1742_s1 }
  0x1b   : > { %s1459_s12 = scalar_lea.hbm %s1744_s2, %s790_s29  ;;  %p1145_p7 = scmp.ne.s32.totalorder %s1445_s6, %s1144_s14 }
  0x1c   : > { %s1745_s22 = scalar_select %p1467_p8, 1, 0 }
  0x1d   : > { %p1147_p9 = pnand %p1467_p8, %p1145_p7  ;;  %p1151_p12 = scmp.lt.u32.totalorder %s1149_s30, %s1144_s14 }
  0x1e   : > { %p1153_p0 = scmp.lt.u32.totalorder %s1144_s14, %s1445_s6 }
  0x1f   : > { %p1148_p10 = pneg %p1147_p9  ;;  %p1152_p13 = por %p1151_p12, %p1150_p11 }
  0x21   : > { %p1154_p1 = por %p1153_p0, %p1152_p13 }
  0x23   : > { %p1155_p2 = pnand %p1154_p1, %p1148_p10 }
  0x25   : > { %1158 = shalt.err (!%p1155_p2)
}
  0x26   : > { %s1159_s25 = scalar_lea.vmem %s1448_s8, 2048  ;;  %s1352_s7 = smov [#allocation6]  }
  0x27   : > { %p1160_p3 = scmp.ne.s32.totalorder %s1448_s8, %s1159_s25  ;;  %s1164_s10 = sshll.u32 %s1352_s7, 4  ;;  %s1165_s10 = int_to_ptr.vmem [resolvable:$false] %s1164_s10 }
  0x28   : > { %s1166_s11 = scalar_lea.vmem %s1165_s10, 4096  ;;  %p1167_p7 = scmp.lt.s32.totalorder %s1448_s8, %s1165_s10 }
  0x29   : > { %p1162_p4 = pnand %p1160_p3, %p1467_p8  ;;  %p1168_p9 = scmp.lt.s32.totalorder %s1166_s11, %s1159_s25 }
  0x2b   : > { %p1163_p5 = pneg %p1162_p4  ;;  %p1169_p11 = por %p1168_p9, %p1167_p7 }
  0x2d   : > { %p1170_p12 = pnand %p1169_p11, %p1163_p5 }
  0x2f   : > { %1173 = shalt.err (!%p1170_p12)
}
  0x30   : > { %s1730_s14 = smov 128   ;;  %s1354_s23 = smov 8  }
  0x31   : > { %1068 = dma.hbm_to_vmem [thread:$0]  (!%p1452_p6), %s1445_s6, 2048, %s1448_s8, %s1461_s13, %s1730_s14, %s1730_s14, %s1354_s23  }
  0x32   : > { %s1495_s24 = sadd.s32 4294967295, %s1350_s20   ;;  %p80_p10 = scmp.ne.s32.totalorder %s1334_s16, %s1330_s15 }
  0x33   : > { %p1732_p13 = scmp.eq.s32.totalorder %s1495_s24, 0  ;;  %p766_p0 = scmp.ge.s32.totalorder %s1350_s20, 1 }
  0x34   : > { %p169_p1 = scmp.lt.s32.totalorder %s1350_s20, 3  ;;  %s1355_s8 = smov [#allocation3]  }
  0x35   : > { %p1504_p2 = por %p1732_p13, %p80_p10  ;;  %s184_s5 = sshll.u32 %s1355_s8, 4  ;;  %s1512_s5 = int_to_ptr.vmem [resolvable:$true] %s184_s5 }
  0x36   : > { %p1508_p3 = pnand %p766_p0, %p169_p1  ;;  %s223_s15 = scalar_lea.vmem [#allocation8], %s1439_s28 }
  0x37   : > { %s1746_s30 = scalar_select %p1504_p2, 1, 0 }
  0x38   : > { %s1747_s6 = scalar_select %p1508_p3, 1, 0 }
  0x39   : > { %p1061_p4 = pneg %p1508_p3  ;;  %s230_s29 = sshll.u32 %s223_s15, 4  ;;  %s1517_s29 = int_to_ptr.vmem [resolvable:$true] %s230_s29 }
  0x3a   : > { %s1174_s7 = scalar_lea.hbm %s1459_s12, 2048  ;;  %s1179_s8 = scalar_lea.hbm %s1744_s2, 4096 }
  0x3b   : > { %p1521_p5 = pnand %p1061_p4, %p1732_p13  ;;  %p1175_p7 = scmp.ne.s32.totalorder %s1459_s12, %s1174_s7 }
  0x3c   : > { %p1180_p12 = scmp.lt.u32.totalorder %s1459_s12, %s1744_s2  ;;  %p1181_p10 = scmp.lt.u32.totalorder %s1179_s8, %s1174_s7 }
  0x3d   : > { %s1748_s25 = scalar_select %p1521_p5, 1, 0 }
  0x3e   : > { %p1177_p9 = pnand %p1175_p7, %p1467_p8  ;;  %p1182_p0 = por %p1181_p10, %p1180_p12 }
  0x3f   : > { %p1183_p1 = scmp.lt.u32.totalorder %s1174_s7, %s1459_s12 }
  0x40   : > { %p1178_p11 = pneg %p1177_p9 }
  0x41   : > { %p1184_p4 = por %p1183_p1, %p1182_p0 }
  0x43   : > { %p1185_p13 = pnand %p1184_p4, %p1178_p11 }
  0x45   : > { %1188 = shalt.err (!%p1185_p13)
}
  0x46   : > { %s1189_s15 = scalar_lea.vmem %s1517_s29, 2048  ;;  %s1356_s10 = smov [#allocation8]  }
  0x47   : > { %p1190_p7 = scmp.ne.s32.totalorder %s1517_s29, %s1189_s15  ;;  %s1194_s11 = sshll.u32 %s1356_s10, 4  ;;  %s1195_s11 = int_to_ptr.vmem [resolvable:$false] %s1194_s11 }
  0x48   : > { %s1196_s26 = scalar_lea.vmem %s1195_s11, 4096  ;;  %p1197_p3 = scmp.lt.s32.totalorder %s1517_s29, %s1195_s11 }
  0x49   : > { %p1192_p9 = pnand %p1190_p7, %p1467_p8  ;;  %p1198_p5 = scmp.lt.s32.totalorder %s1196_s26, %s1189_s15 }
  0x4b   : > { %p1193_p2 = pneg %p1192_p9  ;;  %p1199_p12 = por %p1198_p5, %p1197_p3 }
  0x4d   : > { %p1200_p10 = pnand %p1199_p12, %p1193_p2 }
  0x4f   : > { %1203 = shalt.err (!%p1200_p10)
}
  0x50   : > { %s1749_s14 = smov 128   ;;  %s776_s7 = sshll.u32 %s1346_s19, 7 }
  0x51   : > { %1071 = dma.hbm_to_vmem [thread:$0]  (!%p1452_p6), %s1459_s12, 2048, %s1517_s29, %s1461_s13, %s1749_s14, %s1749_s14, %s1354_s23  }
  0x52   : > { %s1204_s11 = scalar_lea.hbm %s1724_s0, 256  ;;  %p1750_p2 = scmp.ne.s32.totalorder %s1748_s25, 0 }
  0x53   : > { %p1205_p13 = scmp.ne.s32.totalorder %s1724_s0, %s1204_s11  ;;  %p1211_p0 = scmp.lt.u32.totalorder %s1204_s11, %s1724_s0 }
  0x54   : > { %p1206_p3 = pneg %p1750_p2 }
  0x56   : > { %p1207_p5 = pnand %p1206_p3, %p1205_p13 }
  0x58   : > { %p1208_p11 = pneg %p1207_p5 }
  0x5a   : > { %p1213_p1 = pnand %p1211_p0, %p1208_p11 }
  0x5c   : > { %1216 = shalt.err (!%p1213_p1)
}
  0x5d   : > { %s1217_s12 = scalar_lea.vmem %s1512_s5, 256  ;;  %p1225_p12 = scmp.lt.s32.totalorder %s1512_s5, %s1512_s5 }
  0x5e   : > { %p1218_p4 = scmp.ne.s32.totalorder %s1512_s5, %s1217_s12  ;;  %p1226_p10 = scmp.lt.s32.totalorder %s1217_s12, %s1217_s12 }
  0x60   : > { %p1220_p7 = pnand %p1218_p4, %p1206_p3  ;;  %p1227_p6 = por %p1226_p10, %p1225_p12 }
  0x62   : > { %p1221_p9 = pneg %p1220_p7 }
  0x64   : > { %p1228_p8 = pnand %p1227_p6, %p1221_p9 }
  0x66   : > { %1231 = shalt.err (!%p1228_p8)
}
  0x67   : > { %1064 = dma.hbm_to_vmem [thread:$0]  (!%p1750_p2), %s1724_s0, 256, %s1512_s5, [#allocation4], %s1749_s14, %s1749_s14, %s1354_s23  }
  0x68   : > { %s1578_s8 = scalar_lea.hbm %s1727_s3, %s776_s7  ;;  %s244_s25 = scalar_lea.vmem [#allocation9], %s1439_s28 }
  0x69   : > { %s250_s10 = sshll.u32 %s244_s25, 4  ;;  %s1751_s11 = sand.u32 1, %s1338_s17   ;;  %s1581_s10 = int_to_ptr.vmem [resolvable:$true] %s250_s10 }
  0x6a   : > { %s1585_s15 = scalar_lea.sflag [#allocation10], %s1751_s11  ;;  %s1232_s26 = scalar_lea.hbm %s1578_s8, 2048 }
  0x6b   : > { %p1233_p6 = scmp.ne.s32.totalorder %s1578_s8, %s1232_s26  ;;  %p1752_p8 = scmp.ne.s32.totalorder %s1745_s22, 0 }
  0x6c   : > { %s1237_s7 = scalar_lea.hbm %s1727_s3, 4096  ;;  %p1238_p3 = scmp.lt.u32.totalorder %s1578_s8, %s1727_s3 }
  0x6d   : > { %p1235_p13 = pnand %p1233_p6, %p1752_p8  ;;  %p1239_p5 = scmp.lt.u32.totalorder %s1237_s7, %s1232_s26 }
  0x6e   : > { %p1241_p0 = scmp.lt.u32.totalorder %s1232_s26, %s1578_s8 }
  0x6f   : > { %p1236_p2 = pneg %p1235_p13  ;;  %p1240_p11 = por %p1239_p5, %p1238_p3 }
  0x71   : > { %p1242_p1 = por %p1241_p0, %p1240_p11 }
  0x73   : > { %p1243_p4 = pnand %p1242_p1, %p1236_p2 }
  0x75   : > { %1246 = shalt.err (!%p1243_p4)
}
  0x76   : > { %s1247_s28 = scalar_lea.vmem %s1581_s10, 2048  ;;  %s1357_s13 = smov [#allocation9]  }
  0x77   : > { %p1248_p7 = scmp.ne.s32.totalorder %s1581_s10, %s1247_s28  ;;  %s1252_s29 = sshll.u32 %s1357_s13, 4  ;;  %s1253_s29 = int_to_ptr.vmem [resolvable:$false] %s1252_s29 }
  0x78   : > { %s1254_s25 = scalar_lea.vmem %s1253_s29, 4096  ;;  %p1255_p10 = scmp.lt.s32.totalorder %s1581_s10, %s1253_s29 }
  0x79   : > { %p1250_p9 = pnand %p1248_p7, %p1752_p8  ;;  %p1256_p6 = scmp.lt.s32.totalorder %s1254_s25, %s1247_s28 }
  0x7b   : > { %p1251_p12 = pneg %p1250_p9  ;;  %p1257_p13 = por %p1256_p6, %p1255_p10 }
  0x7d   : > { %p1258_p3 = pnand %p1257_p13, %p1251_p12 }
  0x7f   : > { %1261 = shalt.err (!%p1258_p3)
}
  0x80   : > { %s1358_s11 = smov 256   ;;  %p1753_p2 = scmp.ne.s32.totalorder %s1743_s9, 0 }
  0x81   : > { %p1754_p8 = scmp.ne.s32.totalorder %s1747_s6, 0 }
  0x82   : > { %1074 = dma.hbm_to_vmem [thread:$0]  (!%p1753_p2), %s1578_s8, 2048, %s1581_s10, %s1585_s15, %s1358_s11, %s1749_s14, %s1354_s23  }
  0x83   : > { %262 = sbr.rel (%p1754_p8) target bundleno = 717 (0x2cd), region = 36  ;;  %p1755_p5 = scmp.eq.s32.totalorder (!%p1754_p8), %s1495_s24, 0 }
  0x8a   : > { %1313 = dma.done.wait (%p1755_p5), [#allocation4], 256   ;;  %p1756_p11 = pmov %p1755_p5 }
  0x8b   : > { %s268_s22 = sand.u32 1, %s1495_s24   ;;  %s270_s9 = sand.u32 1, %s1334_s16  }
  0x8c   : > { %1315 = vsyncadd (%p1756_p11), [#allocation4], 4294967040  ;;  %s779_s26 = sshll.u32 %s270_s9, 7  ;;  %s269_s5 = scalar_lea.sflag [#allocation7], %s268_s22 }
  0x8d   : > { %s1619_s12 = scalar_lea.vmem [#allocation6], %s779_s26  ;;  %p1757_p0 = scmp.ne.s32.totalorder %s1746_s30, 0 }
  0x8f   : > { %1317 = dma.done.wait (%p1757_p0), %s269_s5, 4096  }
  0x90   : > { %1319 = vsyncadd (%p1757_p0), %s269_s5, 4294963200  ;;  %s1625_s23 = scalar_lea.vmem [#allocation8], %s779_s26  ;;  %s287_s6 = scalar_lea.sflag [#allocation10], %s270_s9 }
  0x91   : > { %s1627_s14 = scalar_lea.vmem [#allocation9], %s779_s26 }
  0x92   : > { %1321 = dma.done.wait (%p1757_p0), %s287_s6, 2048  }
  0x93   : > { %1323 = vsyncadd (%p1757_p0), %s287_s6, 4294965248  ;;  %p782_p1 = scmp.ne.s32.totalorder %s1342_s18, 0 }
  0x94   : > { %v1359_v0 = vmov (!%p782_p1), 0.0  }
  0x95   : > { %327 = sbr.rel (%p782_p1) target bundleno = 156 (0x9c), region = 56  ;;  %328 = vst [vmem:[#allocation2] sm:$0xff] (!%p782_p1), %v1359_v0  ;;  %329 = vst [vmem:[#allocation2 + $0x8] sm:$0xff] (!%p782_p1), %v1359_v0 }
  0x9c PF: > { %v332_v1 = vld [vmem:[%s1619_s12] sm:$0xff]  ;;  %v333_v2 = vld [vmem:[%s1619_s12 + $0x8] sm:$0xff]  ;;  %v334_v3 = vld [vmem:[%s1619_s12 + $0x10] sm:$0xff]  ;;  %p785_p4 = scmp.ne.s32.totalorder %s1342_s18, 1 }
  0x9d   : > { %v951_v4 = vpack.c.bf16 %v333_v2, %v332_v1  ;;  %v335_v5 = vld [vmem:[%s1619_s12 + $0x18] sm:$0xff]  ;;  %v348_v7 = vld [vmem:[%s1625_s23] sm:$0xff]  ;;  %v349_v8 = vld [vmem:[%s1625_s23 + $0x8] sm:$0xff] }
  0x9e   : > { %v955_v6 = vpack.c.bf16 %v335_v5, %v334_v3  ;;  %v983_v9 = vpack.c.bf16 %v349_v8, %v348_v7  ;;  %v350_v10 = vld [vmem:[%s1625_s23 + $0x10] sm:$0xff]  ;;  %v351_v11 = vld [vmem:[%s1625_s23 + $0x18] sm:$0xff]  ;;  %v336_v13 = vld [vmem:[%s1619_s12 + $0x20] sm:$0xff] }
  0x9f   : > { %952 = vmatprep.subr.bf16.mxu0 %v951_v4  ;;  %v987_v12 = vpack.c.bf16 %v351_v11, %v350_v10  ;;  %v337_v14 = vld [vmem:[%s1619_s12 + $0x28] sm:$0xff]  ;;  %v330_v15 = vld [vmem:[#allocation3] sm:$0xff]  ;;  %v352_v17 = vld [vmem:[%s1625_s23 + $0x20] sm:$0xff] }
  0xa0   : > { %954 = vmatpush3.bf16.xpose.msra.mxu0 %v951_v4  ;;  %984 = vmatprep.subr.bf16.mxu1 %v983_v9  ;;  %v959_v16 = vpack.c.bf16 %v337_v14, %v336_v13  ;;  %v353_v18 = vld [vmem:[%s1625_s23 + $0x28] sm:$0xff]  ;;  %v338_v20 = vld [vmem:[%s1619_s12 + $0x30] sm:$0xff]  ;;  %v339_v21 = vld [vmem:[%s1619_s12 + $0x38] sm:$0xff] }
  0xa1   : > { %956 = vmatprep.subr.bf16.mxu0 %v955_v6  ;;  %986 = vmatpush3.bf16.xpose.msra.mxu1 %v983_v9  ;;  %v991_v19 = vpack.c.bf16 %v353_v18, %v352_v17  ;;  %v963_v22 = vpack.c.bf16 %v339_v21, %v338_v20  ;;  %v354_v23 = vld [vmem:[%s1625_s23 + $0x30] sm:$0xff]  ;;  %v355_v24 = vld [vmem:[%s1625_s23 + $0x38] sm:$0xff]  ;;  %v340_v26 = vld [vmem:[%s1619_s12 + $0x40] sm:$0xff] }
  0xa2   : > { %988 = vmatprep.subr.bf16.mxu1 %v987_v12  ;;  %878 = vmatprep.mubr.f32.mxu0 %v330_v15  ;;  %v995_v25 = vpack.c.bf16 %v355_v24, %v354_v23  ;;  %v341_v27 = vld [vmem:[%s1619_s12 + $0x48] sm:$0xff]  ;;  %v356_v29 = vld [vmem:[%s1625_s23 + $0x40] sm:$0xff]  ;;  %v342_v32 = vld [vmem:[%s1619_s12 + $0x50] sm:$0xff] }
  0xa3   : > { %913 = vmatprep.mubr.f32.mxu1 %v330_v15  ;;  %v967_v28 = vpack.c.bf16 %v341_v27, %v340_v26  ;;  %v357_v30 = vld [vmem:[%s1625_s23 + $0x48] sm:$0xff]  ;;  %v343_v33 = vld [vmem:[%s1619_s12 + $0x58] sm:$0xff]  ;;  %v358_v35 = vld [vmem:[%s1625_s23 + $0x50] sm:$0xff] }
  0xa4   : > { %v999_v31 = vpack.c.bf16 %v357_v30, %v356_v29  ;;  %v971_v34 = vpack.c.bf16 %v343_v33, %v342_v32  ;;  %v359_v36 = vld [vmem:[%s1625_s23 + $0x58] sm:$0xff]  ;;  %v344_v38 = vld [vmem:[%s1619_s12 + $0x60] sm:$0xff]  ;;  %v345_v39 = vld [vmem:[%s1619_s12 + $0x68] sm:$0xff] }
  0xa5   : > { %v1003_v37 = vpack.c.bf16 %v359_v36, %v358_v35  ;;  %v975_v40 = vpack.c.bf16 %v345_v39, %v344_v38  ;;  %v360_v41 = vld [vmem:[%s1625_s23 + $0x60] sm:$0xff]  ;;  %v361_v42 = vld [vmem:[%s1625_s23 + $0x68] sm:$0xff]  ;;  %v346_v44 = vld [vmem:[%s1619_s12 + $0x70] sm:$0xff] }
  0xa6   : > { %v1007_v43 = vpack.c.bf16 %v361_v42, %v360_v41  ;;  %v347_v45 = vld [vmem:[%s1619_s12 + $0x78] sm:$0xff]  ;;  %v362_v47 = vld [vmem:[%s1625_s23 + $0x70] sm:$0xff]  ;;  %v532_v50 = vld [vmem:[%s1627_s14] sm:$0xff] }
  0xa7   : > { %v979_v46 = vpack.c.bf16 %v347_v45, %v346_v44  ;;  %v363_v48 = vld [vmem:[%s1625_s23 + $0x78] sm:$0xff]  ;;  %v533_v51 = vld [vmem:[%s1627_s14 + $0x8] sm:$0xff]  ;;  %v534_v53 = vld [vmem:[%s1627_s14 + $0x10] sm:$0xff] }
  0xa8   : > { %958 = vmatpush3.bf16.xpose.msra.mxu0 %v955_v6  ;;  %v1011_v49 = vpack.c.bf16 %v363_v48, %v362_v47  ;;  %v1015_v52 = vpack.c.bf16 %v533_v51, %v532_v50  ;;  %v535_v54 = vld [vmem:[%s1627_s14 + $0x18] sm:$0xff]  ;;  %v536_v57 = vld [vmem:[%s1627_s14 + $0x20] sm:$0xff]  ;;  %v537_v58 = vld [vmem:[%s1627_s14 + $0x28] sm:$0xff] }
  0xa9   : > { %960 = vmatprep.subr.bf16.mxu0 %v959_v16  ;;  %990 = vmatpush3.bf16.xpose.msra.mxu1 %v987_v12  ;;  %v331_v55 = vld [vmem:[#allocation3 + $0x8] sm:$0xff]  ;;  %v1019_v56 = vpack.c.bf16 %v535_v54, %v534_v53  ;;  %v1023_v59 = vpack.c.bf16 %v537_v58, %v536_v57  ;;  %v538_v60 = vld [vmem:[%s1627_s14 + $0x30] sm:$0xff]  ;;  %v540_v63 = vld [vmem:[%s1627_s14 + $0x40] sm:$0xff] }
  0xaa   : > { %992 = vmatprep.subr.bf16.mxu1 %v991_v19  ;;  %v539_v61 = vld [vmem:[%s1627_s14 + $0x38] sm:$0xff]  ;;  %v541_v0 = vld [vmem:[%s1627_s14 + $0x48] sm:$0xff]  ;;  %v542_v2 = vld [vmem:[%s1627_s14 + $0x50] sm:$0xff] }
  0xab   : > { %v1027_v62 = vpack.c.bf16 %v539_v61, %v538_v60  ;;  %v1031_v1 = vpack.c.bf16 %v541_v0, %v540_v63  ;;  %v543_v3 = vld [vmem:[%s1627_s14 + $0x58] sm:$0xff]  ;;  %v544_v5 = vld [vmem:[%s1627_s14 + $0x60] sm:$0xff]  ;;  %v545_v6 = vld [vmem:[%s1627_s14 + $0x68] sm:$0xff] }
  0xac   : > { %v1035_v4 = vpack.c.bf16 %v543_v3, %v542_v2  ;;  %v1039_v7 = vpack.c.bf16 %v545_v6, %v544_v5  ;;  %v546_v8 = vld [vmem:[%s1627_s14 + $0x70] sm:$0xff]  ;;  %v547_v9 = vld [vmem:[%s1627_s14 + $0x78] sm:$0xff]  ;;  %v531_v27 = vld [vmem:[#allocation2 + $0x8] sm:$0xff] }
  0xad   : > { %v1043_v10 = vpack.c.bf16 %v547_v9, %v546_v8 }
  0xb0   : > { %962 = vmatpush3.bf16.xpose.msra.mxu0 %v959_v16 }
  0xb1   : > { %964 = vmatprep.subr.bf16.mxu0 %v963_v22  ;;  %994 = vmatpush3.bf16.xpose.msra.mxu1 %v991_v19 }
  0xb2   : > { %996 = vmatprep.subr.bf16.mxu1 %v995_v25 }
  0xb8   : > { %966 = vmatpush3.bf16.xpose.msra.mxu0 %v963_v22 }
  0xb9   : > { %968 = vmatprep.subr.bf16.mxu0 %v967_v28  ;;  %998 = vmatpush3.bf16.xpose.msra.mxu1 %v995_v25 }
  0xba   : > { %1000 = vmatprep.subr.bf16.mxu1 %v999_v31 }
  0xc0   : > { %970 = vmatpush3.bf16.xpose.msra.mxu0 %v967_v28  ;;  %v530_v28 = vld [vmem:[#allocation2] sm:$0xff] }
  0xc1   : > { %972 = vmatprep.subr.bf16.mxu0 %v971_v34  ;;  %1002 = vmatpush3.bf16.xpose.msra.mxu1 %v999_v31 }
  0xc2   : > { %1004 = vmatprep.subr.bf16.mxu1 %v1003_v37 }
  0xc8   : > { %974 = vmatpush3.bf16.xpose.msra.mxu0 %v971_v34 }
  0xc9   : > { %976 = vmatprep.subr.bf16.mxu0 %v975_v40  ;;  %1006 = vmatpush3.bf16.xpose.msra.mxu1 %v1003_v37 }
  0xca   : > { %1008 = vmatprep.subr.bf16.mxu1 %v1007_v43 }
  0xd0   : > { %978 = vmatpush3.bf16.xpose.msra.mxu0 %v975_v40 }
  0xd1   : > { %980 = vmatprep.subr.bf16.mxu0 %v979_v46  ;;  %1010 = vmatpush3.bf16.xpose.msra.mxu1 %v1007_v43 }
  0xd2   : > { %1012 = vmatprep.subr.bf16.mxu1 %v1011_v49 }
  0xd8   : > { %982 = vmatpush3.bf16.xpose.msra.mxu0 %v979_v46 }
  0xd9   : > { %1016 = vmatprep.subr.bf16.mxu0 %v1015_v52  ;;  %1014 = vmatpush3.bf16.xpose.msra.mxu1 %v1011_v49 }
  0xdf   : > { %879 = vmatmul.mubr.f32.vlgmr.msra.gmra.mrb[0].mxu0 %v331_v55 }
  0xe0   : > { %1018 = vmatpush3.bf16.xpose.msra.mxu0 %v1015_v52  ;;  %914 = vmatmul.mubr.f32.vlgmr.msra.gmra.mrb[0].mxu1 %v331_v55 }
  0xe1   : > { %1020 = vmatprep.subr.bf16.mxu0 %v1019_v56 }
  0xe8   : > { %1022 = vmatpush3.bf16.xpose.msra.mxu0 %v1019_v56 }
  0xe9   : > { %1024 = vmatprep.subr.bf16.mxu0 %v1023_v59 }
  0xf0   : > { %1026 = vmatpush3.bf16.xpose.msra.mxu0 %v1023_v59 }
  0xf1   : > { %1028 = vmatprep.subr.bf16.mxu0 %v1027_v62 }
  0xf8   : > { %1030 = vmatpush3.bf16.xpose.msra.mxu0 %v1027_v62 }
  0xf9   : > { %1032 = vmatprep.subr.bf16.mxu0 %v1031_v1 }
 0x100   : > { %1034 = vmatpush3.bf16.xpose.msra.mxu0 %v1031_v1 }
 0x101   : > { %1036 = vmatprep.subr.bf16.mxu0 %v1035_v4 }
 0x108   : > { %1038 = vmatpush3.bf16.xpose.msra.mxu0 %v1035_v4 }
 0x109   : > { %1040 = vmatprep.subr.bf16.mxu0 %v1039_v7 }
 0x110   : > { %1042 = vmatpush3.bf16.xpose.msra.mxu0 %v1039_v7 }
 0x111   : > { %1044 = vmatprep.subr.bf16.mxu0 %v1043_v10 }
 0x118   : > { %1046 = vmatpush3.bf16.xpose.msra.mxu0 %v1043_v10 }
 0x1b2   : > { %v880_v11 = vpop.f32.mrb[0].mxu0 }
 0x1b3   : > { %v784_v12 = vmul.f32 -1.442695, %v880_v11  ;;  %v430_v13 = vpop.f32.mrb[1].mxu0  ;;  %v915_v15 = vpop.f32.mrb[0].mxu1 }
 0x1b4   : > { %v783_v14 = vmul.f32 -1.442695, %v430_v13  ;;  %v505_v16 = vpop.f32.mrb[1].mxu1 }
 0x1b5   : > { %1136 = vpow2.f32 %v784_v12 }
 0x1b6   : > { %1138 = vpow2.f32 %v783_v14 }
 0x1bf   : > { %v1137_v17 = vpop.eup %1136 }
 0x1c0   : > { %v1139_v18 = vpop.eup %1138  ;;  %v521_v19 = vadd.f32 1.0, %v1137_v17 }
 0x1c1   : > { %v520_v20 = vadd.f32 1.0, %v1139_v18 }
 0x1c2   : > { %1140 = vrcp.f32 %v521_v19 }
 0x1c3   : > { %1142 = vrcp.f32 %v520_v20 }
 0x1cc   : > { %v1141_v21 = vpop.eup %1140 }
 0x1cd   : > { %v1143_v22 = vpop.eup %1142  ;;  %v527_v23 = vmul.f32 %v1141_v21, %v880_v11 }
 0x1ce   : > { %v526_v24 = vmul.f32 %v1143_v22, %v430_v13 }
 0x1cf   : > { %v529_v25 = vmul.f32 %v915_v15, %v527_v23 }
 0x1d0   : > { %v528_v26 = vmul.f32 %v526_v24, %v505_v16 }
 0x1d2   : > { %948 = vmatprep.mubr.f32.mxu0 %v528_v26 }
 0x1d3   : > { %949 = vmatmul.mubr.f32.vlgmr.msra.gmra.mrb[2].mxu0 %v529_v25 }
 0x2a4   : > { %630 = sbr.rel (%p785_p4) target bundleno = 691 (0x2b3), region = 60 }
 0x2a6   : > { %v950_v29 = vpop.f32.mrb[2].mxu0 }
 0x2a7   : > { %v624_v30 = vadd.f32 %v950_v29, %v531_v27  ;;  %v614_v31 = vpop.f32.mrb[3].mxu0 }
 0x2a8   : > { %v623_v32 = vadd.f32 %v614_v31, %v530_v28 }
 0x2a9   : > { %626 = vst [vmem:[#allocation2 + $0x8] sm:$0xff] %v624_v30 }
 0x2aa   : > { %625 = vst [vmem:[#allocation2] sm:$0xff] %v623_v32 }
 0x2b0   : > { %v632_v34 = vld [vmem:[#allocation2 + $0x8] sm:$0xff] }
 0x2b1   : > { %v631_v33 = vld [vmem:[#allocation2] sm:$0xff]  ;;  %634 = vst [vmem:[#allocation11 + $0x8] sm:$0xff] %v632_v34 }
 0x2b2   : > { %633 = vst [vmem:[#allocation11] sm:$0xff] %v631_v33 }
 0x2b3 PF: > { %p1078_p7 = scmp.eq.s32.totalorder %s1495_s24, 1  ;;  %s1360_s30 = smov [#allocation11]  }
 0x2b4   : > { %s644_s8 = sshll.u32 %s1360_s30, 4  ;;  %s645_s8 = int_to_ptr.vmem [resolvable:$true] %s644_s8 }
 0x2b5   : > { %s1262_s10 = scalar_lea.vmem %s645_s8, 256  ;;  %p1269_p6 = scmp.lt.s32.totalorder %s645_s8, %s645_s8 }
 0x2b6   : > { %p1263_p9 = scmp.ne.s32.totalorder %s645_s8, %s1262_s10  ;;  %p1270_p13 = scmp.lt.s32.totalorder %s1262_s10, %s1262_s10 }
 0x2b8   : > { %p1264_p12 = pnand %p1263_p9, %p1078_p7  ;;  %p1271_p3 = por %p1270_p13, %p1269_p6 }
 0x2ba   : > { %p1265_p10 = pneg %p1264_p12 }
 0x2bc   : > { %p1272_p2 = pnand %p1271_p3, %p1265_p10 }
 0x2be   : > { %1275 = shalt.err (!%p1272_p2)
}
 0x2bf   : > { %s1276_s7 = scalar_lea.hbm %s1728_s4, 256 }
 0x2c0   : > { %p1277_p8 = scmp.ne.s32.totalorder %s1728_s4, %s1276_s7  ;;  %p1282_p0 = scmp.lt.u32.totalorder %s1276_s7, %s1728_s4 }
 0x2c2   : > { %p1278_p5 = pnand %p1277_p8, %p1078_p7 }
 0x2c4   : > { %p1279_p11 = pneg %p1278_p5 }
 0x2c6   : > { %p1284_p1 = pnand %p1282_p0, %p1279_p11 }
 0x2c8   : > { %1287 = shalt.err (!%p1284_p1)
}
 0x2c9   : > { %s1361_s29 = smov 128   ;;  %s1362_s25 = smov 8  }
 0x2ca   : > { %1058 = dma.vmem_to_hbm [thread:$0]  (%p1078_p7), %s645_s8, 256, %s1728_s4, [#allocation5], %s1361_s29, %s1361_s29, %s1362_s25  }
 0x2cb   : > { %1325 = dma.done.wait (%p1078_p7), [#allocation5], 256  }
 0x2cc   : > { %1327 = vsyncadd (%p1078_p7), [#allocation5], 4294967040 }
 0x2cd PF: > { %s22_s20 = sadd.s32 1, %s1350_s20   ;;  %s1758_s15 = smov %s1334_s16 }
 0x2ce   : > { %p19_p4 = scmp.ge.s32.totalorder %s22_s20, 4   ;;  %s1759_s16 = smov %s1338_s17 }
 0x2cf   : > { %s1760_s17 = smov %s1435_s27  ;;  %s1761_s18 = smov %s1346_s19 }
 0x2d0   : > { %s1762_s19 = smov %s1764_s21  ;;  %21 = sbr.rel (!%p19_p4) target bundleno = 11 (0xb), region = 112 }
 0x2d7   :  { %660 = vsyncpa [#allocation4], 1 }
 0x2d8   :  { %662 = vsyncpa [#allocation4 + $0x1], 1 }
 0x2d9   :  { %663 = vsyncpa [#allocation7], 1 }
 0x2da   :  { %665 = vsyncpa [#allocation7 + $0x1], 1 }
 0x2db   :  { %666 = vsyncpa [#allocation10], 1 }
 0x2dc   :  { %668 = vsyncpa [#allocation10 + $0x1], 1 }
 0x2dd   :  { %669 = vsyncpa [#allocation5], 1 }
 0x2de   :  { %671 = vsyncpa [#allocation5 + $0x1], 1 }

</bundles_post_ra>
